<compile_context>
chip_gen: v6e
topology: v6e:2x2x1
jax: 0.10.0
libtpu: 0.0.40
codegen_flags: <defaults>
</compile_context>

<pallas_src>
import math

import jax
import jax.numpy as jnp
from jax.experimental import pallas as pl
from jax.experimental.pallas import tpu as pltpu


def _drop_path_kernel(x_ref, mask_ref, o_ref):
    """out = cast(x * mask_scaled); mask_scaled is (tn, 1) f32, lane-broadcast."""
    o_ref[...] = (x_ref[...] * mask_ref[...]).astype(o_ref.dtype)


def _round_up(a, b):
    return (a + b - 1) // b * b


def drop_path(x, p, key, training=True, donate_x=False):
    """JAX/Pallas equivalent of DropPath.forward.

    Matches PyTorch semantics:
      - training and p > 0: mask ~ Bernoulli(keep_prob) of shape (N,1,...,1),
        return x / keep_prob * mask
      - otherwise: identity
    """
    if (not training) or p <= 0.0:
        return x

    keep_prob = 1.0 - p
    n = x.shape[0]
    feat = math.prod(x.shape[1:]) if len(x.shape) > 1 else 1
    feat = max(feat, 1)

    x2 = x.reshape(n, feat)

    # Per-sample Bernoulli keep mask, pre-scaled by 1/keep_prob, kept in f32
    # so the scale is not quantized for bf16/fp16 inputs (O(N) setup).
    mask = jax.random.bernoulli(key, keep_prob, (n, 1)).astype(jnp.float32)
    mask = mask * jnp.float32(1.0 / keep_prob)

    # ---- Tile selection: size by bytes, never pad beyond (8, 128) ----------
    itemsize = jnp.dtype(x.dtype).itemsize
    LANE, SUB = 128, 8
    target_tile_bytes = 4 << 20  # ~4 MiB per tile (in + out, double-buffered -> ~16 MiB)

    f_aligned = _round_up(feat, LANE)
    row_bytes = f_aligned * itemsize

    # Sublane tile: grow when rows are short so the tile still hits the byte
    # target; shrink to 8 when a single row already fills the budget.
    tn_cap = max(SUB, min(1024, (target_tile_bytes // max(row_bytes, 1)) // SUB * SUB))
    tn = min(_round_up(n, SUB), tn_cap)
    tn = max(tn, SUB)

    # Lane tile: from the byte budget, multiple of 128, capped at the
    # 128-aligned feature extent (edge blocks handled by the ragged grid).
    tf = _round_up(max(target_tile_bytes // (tn * itemsize), LANE), LANE)
    tf = min(tf, f_aligned)

    grid_i = pl.cdiv(n, tn)
    grid_j = pl.cdiv(feat, tf)

    # v7x megacore: expose >=2 parallel grid steps when the tensor is big
    # enough to make it worthwhile (both TCs get work).
    if grid_i * grid_j < 2 and n * feat * itemsize >= (1 << 20) and tf > LANE:
        tf = _round_up(pl.cdiv(tf, 2), LANE)
        grid_j = pl.cdiv(feat, tf)

    # VMEM budget: x + out tiles, double-buffered, plus mask + slack.
    # Capped at 32 MiB -> safe on v5e/v6e (128 MiB) and v7x (64 MiB).
    tile_bytes = tn * tf * itemsize
    vmem_limit = int(min(max(4 * tile_bytes + (2 << 20), 8 << 20), 32 << 20))

    out = pl.pallas_call(
        _drop_path_kernel,
        out_shape=jax.ShapeDtypeStruct((n, feat), x.dtype),
        grid=(grid_i, grid_j),
        in_specs=[
            pl.BlockSpec((tn, tf), lambda i, j: (i, j)),
            pl.BlockSpec((tn, 1), lambda i, j: (i, 0)),
        ],
        out_specs=pl.BlockSpec((tn, tf), lambda i, j: (i, j)),
        compiler_params=pltpu.CompilerParams(
            dimension_semantics=("parallel", "parallel"),
            vmem_limit_bytes=vmem_limit,
        ),
        input_output_aliases=({0: 0} if donate_x else {}),
    )(x2, mask)

    return out.reshape(x.shape)


if __name__ == "__main__":
    key = jax.random.PRNGKey(0)
    kx, km, kx2, km2 = jax.random.split(key, 4)
    p = 0.5
    keep_prob = 1.0 - p

    # --- Case 1: small NCHW input, f32, lane-aligned feature count ----------
    x = jax.random.normal(kx, (2, 4, 16, 16), dtype=jnp.float32)
    y = drop_path(x, p, km, training=True)
    y = jax.block_until_ready(y)

    ref_mask = jax.random.bernoulli(km, keep_prob, (x.shape[0], 1)).astype(
        jnp.float32
    ).reshape(x.shape[0], 1, 1, 1)
    ref = x * (ref_mask * (1.0 / keep_prob))
    assert y.shape == x.shape and y.dtype == x.dtype
    assert jnp.allclose(y, ref, atol=1e-6, rtol=1e-6)

    # --- Case 2: ragged shapes (n not %8, feat not %128) exercise edge blocks
    x_r = jax.random.normal(kx2, (3, 5, 10, 10), dtype=jnp.float32)
    y_r = drop_path(x_r, p, km2, training=True)
    y_r = jax.block_until_ready(y_r)

    ref_mask_r = jax.random.bernoulli(km2, keep_prob, (x_r.shape[0], 1)).astype(
        jnp.float32
    ).reshape(x_r.shape[0], 1, 1, 1)
    ref_r = x_r * (ref_mask_r * (1.0 / keep_prob))
    assert y_r.shape == x_r.shape and y_r.dtype == x_r.dtype
    assert jnp.allclose(y_r, ref_r, atol=1e-6, rtol=1e-6)

    # --- Eval / p == 0 path is the identity (no kernel needed) --------------
    y_eval = drop_path(x, p, km, training=False)
    assert jnp.array_equal(y_eval, x)
    y_p0 = drop_path(x, 0.0, km, training=True)
    assert jnp.array_equal(y_p0, x)

    print("KERNEL_OK")
</pallas_src>

<mosaic_0001>
module attributes {stable_mosaic.version = 11 : i64} {
  func.func @_drop_path_kernel(%arg0: i32, %arg1: i32, %arg2: memref<8x1024xf32, #tpu.memory_space<vmem>>, %arg3: memref<8x1xf32, #tpu.memory_space<vmem>>, %arg4: memref<8x1024xf32, #tpu.memory_space<vmem>>) attributes {dimension_semantics = [#tpu.dimension_semantics<parallel>, #tpu.dimension_semantics<parallel>], iteration_bounds = array<i64: 1, 1>, scalar_prefetch = 0 : i64, scratch_operands = 0 : i64, tpu.core_type = #tpu.core_type<tc>, window_params = [{transform_indices = @transform_0, window_bounds = array<i64: 8, 1024>}, {transform_indices = @transform_1, window_bounds = array<i64: 8, 1>}, {transform_indices = @transform_2, window_bounds = array<i64: 8, 1024>}]} {
    %c0 = arith.constant 0 : index
    %c0_0 = arith.constant 0 : index
    %0 = vector.load %arg2[%c0, %c0_0] : memref<8x1024xf32, #tpu.memory_space<vmem>>, vector<8x1024xf32>
    %c0_1 = arith.constant 0 : index
    %c0_2 = arith.constant 0 : index
    %1 = vector.load %arg3[%c0_1, %c0_2] : memref<8x1xf32, #tpu.memory_space<vmem>>, vector<8x1xf32>
    %2 = vector.broadcast %1 : vector<8x1xf32> to vector<8x1024xf32>
    %3 = arith.mulf %0, %2 : vector<8x1024xf32>
    %c0_3 = arith.constant 0 : index
    %c0_4 = arith.constant 0 : index
    %4 = vector.load %arg4[%c0_3, %c0_4] : memref<8x1024xf32, #tpu.memory_space<vmem>>, vector<8x1024xf32>
    tpu.vector_store %arg4[%c0_3, %c0_4], %3 {strides = array<i32>} : memref<8x1024xf32, #tpu.memory_space<vmem>>, vector<8x1024xf32>,
    return
  }
  func.func @transform_0(%arg0: i32, %arg1: i32) -> (i32, i32) {
    %c0_i32 = arith.constant 0 : i32
    return %arg0, %arg1 : i32, i32
  }
  func.func @transform_1(%arg0: i32, %arg1: i32) -> (i32, i32) {
    %c0_i32 = arith.constant 0 : i32
    %c0_i32_0 = arith.constant 0 : i32
    return %arg0, %c0_i32 : i32, i32
  }
  func.func @transform_2(%arg0: i32, %arg1: i32) -> (i32, i32) {
    %c0_i32 = arith.constant 0 : i32
    return %arg0, %arg1 : i32, i32
  }
}

</mosaic_0001>

<bundles_post_ra>
// kernel: tpu_custom_call.1
= control target key start
LH: loop header
LB: loop body
LE: loop exit
PB: predicated region body
PF: predicated region fallthrough
CT: control target
= control target key end

     0   :  { %7 = vsyncpa [#allocation3], 0  ;;  %s197_s0 = inlined_call_operand.hbm [shape: f32[2,1024], index: 0, kind: input, shape index: {}]   ;;  %s198_s1 = inlined_call_operand.vmem [shape: f32[2,1], index: 1, kind: input, shape index: {}]   ;;  %s199_s2 = inlined_call_operand.hbm [shape: f32[2,1024], index: 2, kind: output, shape index: {}]  }
   0x1   :  { %8 = vsyncpa [#allocation4], 0 }
   0x2   :  { %13 = vsyncadd [#allocation3], 768  ;;  %s158_s9 = smov [#allocation2]  }
   0x3   :  { %s14_s10 = sshll.u32 %s158_s9, 4  ;;  %s15_s10 = int_to_ptr.vmem [resolvable:$true] %s14_s10 }
   0x4   :  { %s122_s11 = scalar_lea.vmem %s15_s10, 256  ;;  %s126_s12 = scalar_lea.vmem %s15_s10, 1024 }
   0x5   :  { %p123_p0 = scmp.ne.s32.totalorder %s15_s10, %s122_s11  ;;  %p127_p1 = scmp.lt.s32.totalorder %s15_s10, %s15_s10 }
   0x6   :  { %p128_p2 = scmp.lt.s32.totalorder %s126_s12, %s122_s11 }
   0x8   :  { %p129_p3 = por %p128_p2, %p127_p1 }
   0xa   :  { %p130_p4 = pnand %p129_p3, %p123_p0 }
   0xc   :  { %133 = shalt.err (!%p130_p4)
}
   0xd   :  { %s159_s13 = smov 256   ;;  %s160_s14 = smov 16  }
   0xe   :  { %20 = dma.hbm_to_vmem [thread:$0]  %s197_s0, 256, %s15_s10, [#allocation3], %s159_s13, %s159_s13, %s160_s14  }
   0xf   :  { %154 = dma.done.wait [#allocation3], 1024  }
  0x10   :  { %155 = vsyncadd [#allocation3], 4294966272  ;;  %v161_v0 = vmov 0   ;;  %v34_v1 = vld [vmem:[%s198_s1] sm:$0xff]  ;;  %v42_v2 = vlaneseq  ;;  %v162_v3 = vmov 269488144  }
  0x11   :  { %113 = vset.pattern.permute.xlu0 %v161_v0  ;;  %v40_v4 = vunpack.c.l.s4 %v162_v3  ;;  %v163_v5 = vmov 842150450   ;;  %v164_v7 = vmov 1414812756   ;;  %v165_v9 = vmov 1987475062  }
  0x12   :  { %37 = vperm.xlu0 %113, %v34_v1   ;;  %v47_v6 = vunpack.c.l.s4 %v163_v5  ;;  %v54_v8 = vunpack.c.l.s4 %v164_v7  ;;  %v61_v10 = vunpack.c.l.s4 %v165_v9  ;;  %v43_v11 = vshrl.u32 %v42_v2, 7  ;;  %v26_v20 = vld [vmem:[#allocation2] sm:$0xff]  ;;  %v27_v21 = vld [vmem:[#allocation2 + $0x8] sm:$0xff]  ;;  %v28_v23 = vld [vmem:[#allocation2 + $0x10] sm:$0xff] }
  0x13   :  { %v41_v12 = vunpack.c.0.s8 %v40_v4  ;;  %v29_v24 = vld [vmem:[#allocation2 + $0x18] sm:$0xff]  ;;  %v30_v25 = vld [vmem:[#allocation2 + $0x20] sm:$0xff]  ;;  %v31_v26 = vld [vmem:[#allocation2 + $0x28] sm:$0xff] }
  0x14   :  { %v48_v13 = vunpack.c.0.s8 %v47_v6  ;;  %v55_v14 = vunpack.c.0.s8 %v54_v8  ;;  %v62_v15 = vunpack.c.0.s8 %v61_v10  ;;  %v32_v27 = vld [vmem:[#allocation2 + $0x30] sm:$0xff]  ;;  %v33_v28 = vld [vmem:[#allocation2 + $0x38] sm:$0xff] }
  0x15   :  { %v44_v16 = vsub.s32 %v41_v12, %v43_v11 }
  0x16   :  { %v51_v17 = vsub.s32 %v48_v13, %v43_v11  ;;  %v58_v18 = vsub.s32 %v55_v14, %v43_v11  ;;  %v65_v19 = vsub.s32 %v62_v15, %v43_v11 }
  0x8d   :  { %v38_v22 = vpop.permute.xlu0 %37 }
  0x8e   :  { %v45_v29 = vrot.slane %v38_v22, %v44_v16  ;;  %v52_v30 = vrot.slane %v38_v22, %v51_v17  ;;  %v59_v31 = vrot.slane %v38_v22, %v58_v18  ;;  %v66_v32 = vrot.slane %v38_v22, %v65_v19 }
  0x90   :  { %v71_v33 = vmul.f32 %v45_v29, %v26_v20  ;;  %v72_v34 = vmul.f32 %v45_v29, %v27_v21  ;;  %v73_v35 = vmul.f32 %v52_v30, %v28_v23  ;;  %v74_v36 = vmul.f32 %v52_v30, %v29_v24 }
  0x91   :  { %v75_v37 = vmul.f32 %v59_v31, %v30_v25  ;;  %v76_v38 = vmul.f32 %v59_v31, %v31_v26  ;;  %v77_v39 = vmul.f32 %v66_v32, %v32_v27  ;;  %v78_v40 = vmul.f32 %v66_v32, %v33_v28 }
  0x92   :  { %79 = vst [vmem:[#allocation5] sm:$0xff] %v71_v33  ;;  %80 = vst [vmem:[#allocation5 + $0x8] sm:$0xff] %v72_v34 }
  0x93   :  { %81 = vst [vmem:[#allocation5 + $0x10] sm:$0xff] %v73_v35  ;;  %82 = vst [vmem:[#allocation5 + $0x18] sm:$0xff] %v74_v36 }
  0x94   :  { %83 = vst [vmem:[#allocation5 + $0x20] sm:$0xff] %v75_v37  ;;  %84 = vst [vmem:[#allocation5 + $0x28] sm:$0xff] %v76_v38 }
  0x95   :  { %85 = vst [vmem:[#allocation5 + $0x30] sm:$0xff] %v77_v39  ;;  %86 = vst [vmem:[#allocation5 + $0x38] sm:$0xff] %v78_v40 }
  0x96   :  { %91 = vsyncadd [#allocation4], 768  ;;  %s166_s0 = smov [#allocation5]  }
  0x97   :  { %s92_s1 = sshll.u32 %s166_s0, 4  ;;  %s93_s1 = int_to_ptr.vmem [resolvable:$true] %s92_s1 }
  0x98   :  { %s134_s19 = scalar_lea.vmem %s93_s1, 256  ;;  %s138_s20 = scalar_lea.vmem %s93_s1, 1024 }
  0x99   :  { %p135_p5 = scmp.ne.s32.totalorder %s93_s1, %s134_s19  ;;  %p139_p6 = scmp.lt.s32.totalorder %s93_s1, %s93_s1 }
  0x9a   :  { %p140_p7 = scmp.lt.s32.totalorder %s138_s20, %s134_s19 }
  0x9c   :  { %p141_p8 = por %p140_p7, %p139_p6 }
  0x9e   :  { %p142_p9 = pnand %p141_p8, %p135_p5 }
  0xa0   :  { %145 = shalt.err (!%p142_p9)
}
  0xa1   :  { %98 = dma.vmem_to_hbm [thread:$0]  %s93_s1, 256, %s199_s2, [#allocation4], %s159_s13, %s159_s13, %s160_s14  }
  0xa2   :  { %156 = dma.done.wait [#allocation4], 1024  }
  0xa3   :  { %157 = vsyncadd [#allocation4], 4294966272 }
  0xa4   :  { %102 = vsyncpa [#allocation3], 1 }
  0xa5   :  { %103 = vsyncpa [#allocation4], 1 }

</bundles_post_ra>
